<compile_context>
chip_gen: v5e
topology: v5e:2x2
jax: 0.10.0
libtpu: 0.0.40
codegen_flags: <defaults>
</compile_context>

<pallas_src>
import jax
import jax.numpy as jnp
from jax.experimental import pallas as pl
from jax.experimental.pallas import tpu as pltpu


def _round_up(x, m):
    return (x + m - 1) // m * m


def _mlp_kernel(x_ref,
                w1_ref, b1_ref,
                w2_ref, b2_ref,
                w3_ref, b3_ref,
                wo_ref, bo_ref,
                out_ref):
    # Hidden block 1 (its BN affine is folded into W2/b2).
    h = jnp.dot(x_ref[...].astype(jnp.bfloat16), w1_ref[...],
                preferred_element_type=jnp.float32)
    h = jnp.maximum(h + b1_ref[...], 0.0)

    # Hidden block 2 (BN2 folded into W3/b3).
    h = jnp.dot(h.astype(jnp.bfloat16), w2_ref[...],
                preferred_element_type=jnp.float32)
    h = jnp.maximum(h + b2_ref[...], 0.0)

    # Hidden block 3 (BN3 folded into the head).
    h = jnp.dot(h.astype(jnp.bfloat16), w3_ref[...],
                preferred_element_type=jnp.float32)
    h = jnp.maximum(h + b3_ref[...], 0.0)

    # Output head (out_features == 1): VPU multiply + cross-lane (XLU) sum
    # avoids a 1-lane MXU result.
    out_ref[...] = (jnp.sum(h * wo_ref[...], axis=-1, keepdims=True)
                    + bo_ref[...])


def enhanced_mlp_forward(x, params, *, tile_b=256):
    """params: [W1,b1, W2,b2, W3,b3, wo_row,bo] from build_params()."""
    B, F = x.shape
    # Row tile: multiple of 8 (sublane), capped at tile_b (256 fills the MXU on
    # v6e/v7x, is a 2x multiple of the 128-row MXU on v5e). Pad the ragged tail.
    tb = min(tile_b, _round_up(B, 8))
    Bp = _round_up(B, tb)
    if Bp != B:
        x = jnp.pad(x, ((0, Bp - B), (0, 0)))
    grid = (Bp // tb,)

    x_spec = pl.BlockSpec((tb, F), lambda i: (i, 0))
    out_spec = pl.BlockSpec((tb, 1), lambda i: (i, 0))
    # Whole-array blocks with a constant index_map: weights/biases stay
    # VMEM-resident across grid steps; only the x/out tiles are re-DMA'd.
    param_specs = [pl.BlockSpec(p.shape, lambda i: (0, 0)) for p in params]

    h1, h2, h3 = params[0].shape[1], params[2].shape[1], params[4].shape[1]
    flops = 2 * Bp * (F * h1 + h1 * h2 + h2 * h3 + h3)
    bytes_accessed = (x.size * x.dtype.itemsize + Bp * 4
                      + sum(int(p.size) * p.dtype.itemsize for p in params))

    out = pl.pallas_call(
        _mlp_kernel,
        out_shape=jax.ShapeDtypeStruct((Bp, 1), jnp.float32),
        grid=grid,
        in_specs=[x_spec] + param_specs,
        out_specs=out_spec,
        compiler_params=pltpu.CompilerParams(
            dimension_semantics=("parallel",)),
        cost_estimate=pl.CostEstimate(flops=flops, transcendentals=0,
                                      bytes_accessed=bytes_accessed),
    )(x, *params)
    return out[:B]


def build_params(key, input_size, hidden_sizes=(256, 128, 64)):
    """Returns (kernel_params, ref_params).

    ref_params: eval-mode module params, BatchNorm as a separate per-feature
      (scale, shift) affine per hidden block (f32).
    kernel_params: same network with each block's BN affine folded into the
      *next* Linear, matmul weights cast to bf16, head weight stored as a row.
    """
    eps = 1e-5
    n_h = len(hidden_sizes)
    keys = jax.random.split(key, 4 * n_h + 2)
    ki = 0
    Ws, bs, scales, shifts = [], [], [], []
    prev = input_size
    for h in hidden_sizes:
        bound = 1.0 / jnp.sqrt(prev)
        W = jax.random.uniform(keys[ki], (prev, h), jnp.float32, -bound, bound); ki += 1
        b = jax.random.uniform(keys[ki], (1, h), jnp.float32, -bound, bound); ki += 1
        gamma = 1.0 + 0.1 * jax.random.normal(keys[ki], (1, h), jnp.float32); ki += 1
        beta = 0.1 * jax.random.normal(keys[ki], (1, h), jnp.float32); ki += 1
        # Non-trivial running stats so the BN fold is actually exercised.
        running_mean = (0.05 * jnp.arange(h, dtype=jnp.float32) / h).reshape(1, h)
        running_var = (1.0 + 0.1 * jnp.abs(jnp.sin(jnp.arange(h, dtype=jnp.float32)))).reshape(1, h)
        scale = gamma / jnp.sqrt(running_var + eps)
        shift = beta - running_mean * scale
        Ws.append(W); bs.append(b); scales.append(scale); shifts.append(shift)
        prev = h
    bound = 1.0 / jnp.sqrt(prev)
    Wo = jax.random.uniform(keys[ki], (prev, 1), jnp.float32, -bound, bound); ki += 1
    bo = jax.random.uniform(keys[ki], (1, 1), jnp.float32, -bound, bound); ki += 1

    ref_params = []
    for W, b, s, t in zip(Ws, bs, scales, shifts):
        ref_params += [W, b, s, t]
    ref_params += [Wo, bo]

    # Fold BN_i into Linear_{i+1}: (h*s + t) @ W + b == h @ (s.T * W) + (t @ W + b)
    W1f, b1f = Ws[0], bs[0]
    W2f = scales[0].T * Ws[1]
    b2f = shifts[0] @ Ws[1] + bs[1]
    W3f = scales[1].T * Ws[2]
    b3f = shifts[1] @ Ws[2] + bs[2]
    Wof = scales[2].T * Wo              # (H3, 1)
    bof = shifts[2] @ Wo + bo           # (1, 1)
    wo_row = Wof.T                      # (1, H3) for the VPU head

    kernel_params = [W1f.astype(jnp.bfloat16), b1f,
                     W2f.astype(jnp.bfloat16), b2f,
                     W3f.astype(jnp.bfloat16), b3f,
                     wo_row, bof]
    return kernel_params, ref_params


def reference_forward(x, ref_params):
    """Plain-JAX f32 reference of the eval-mode module forward pass."""
    # TODO(synk): Dropout is train-time only (identity in eval); BatchNorm uses
    # running statistics (eval mode) — training-mode batch stats are not modeled.
    h = x
    for i in range(3):
        W, b, s, t = ref_params[4 * i:4 * i + 4]
        h = jnp.maximum(h @ W + b, 0.0) * s + t
    Wo, bo = ref_params[-2], ref_params[-1]
    return h @ Wo + bo


if __name__ == "__main__":
    key = jax.random.PRNGKey(0)
    k_x, k_p = jax.random.split(key)

    batch, input_size = 8, 32
    x = jax.random.normal(k_x, (batch, input_size), jnp.float32)
    kernel_params, ref_params = build_params(k_p, input_size, hidden_sizes=(256, 128, 64))

    out = enhanced_mlp_forward(x, kernel_params)
    out = jax.block_until_ready(out)

    ref = reference_forward(x, ref_params)
    assert out.shape == (batch, 1)
    # bf16 matmul inputs with f32 accumulation => loosened tolerance vs f32 ref.
    assert jnp.allclose(out, ref, atol=5e-2, rtol=5e-2), \
        float(jnp.max(jnp.abs(out - ref)))

    print("KERNEL_OK")
</pallas_src>

<mosaic_0001>
module attributes {stable_mosaic.version = 11 : i64} {
  func.func @_mlp_kernel(%arg0: i32, %arg1: memref<8x32xf32, #tpu.memory_space<vmem>>, %arg2: memref<32x256xbf16, #tpu.memory_space<vmem>>, %arg3: memref<1x256xf32, #tpu.memory_space<vmem>>, %arg4: memref<256x128xbf16, #tpu.memory_space<vmem>>, %arg5: memref<1x128xf32, #tpu.memory_space<vmem>>, %arg6: memref<128x64xbf16, #tpu.memory_space<vmem>>, %arg7: memref<1x64xf32, #tpu.memory_space<vmem>>, %arg8: memref<1x64xf32, #tpu.memory_space<vmem>>, %arg9: memref<1x1xf32, #tpu.memory_space<vmem>>, %arg10: memref<8x1xf32, #tpu.memory_space<vmem>>) attributes {dimension_semantics = [#tpu.dimension_semantics<parallel>], iteration_bounds = array<i64: 1>, scalar_prefetch = 0 : i64, scratch_operands = 0 : i64, tpu.core_type = #tpu.core_type<tc>, window_params = [{transform_indices = @transform_0, window_bounds = array<i64: 8, 32>}, {pipeline_mode = #tpu.pipeline_mode<synchronous>, transform_indices = @transform_1, window_bounds = array<i64: 32, 256>}, {pipeline_mode = #tpu.pipeline_mode<synchronous>, transform_indices = @transform_2, window_bounds = array<i64: 1, 256>}, {pipeline_mode = #tpu.pipeline_mode<synchronous>, transform_indices = @transform_3, window_bounds = array<i64: 256, 128>}, {pipeline_mode = #tpu.pipeline_mode<synchronous>, transform_indices = @transform_4, window_bounds = array<i64: 1, 128>}, {pipeline_mode = #tpu.pipeline_mode<synchronous>, transform_indices = @transform_5, window_bounds = array<i64: 128, 64>}, {pipeline_mode = #tpu.pipeline_mode<synchronous>, transform_indices = @transform_6, window_bounds = array<i64: 1, 64>}, {pipeline_mode = #tpu.pipeline_mode<synchronous>, transform_indices = @transform_7, window_bounds = array<i64: 1, 64>}, {pipeline_mode = #tpu.pipeline_mode<synchronous>, transform_indices = @transform_8, window_bounds = array<i64: 1, 1>}, {transform_indices = @transform_9, window_bounds = array<i64: 8, 1>}]} {
    %c0 = arith.constant 0 : index
    %c0_0 = arith.constant 0 : index
    %0 = vector.load %arg1[%c0, %c0_0] : memref<8x32xf32, #tpu.memory_space<vmem>>, vector<8x32xf32>
    %1 = arith.truncf %0 : vector<8x32xf32> to vector<8x32xbf16>
    %c0_1 = arith.constant 0 : index
    %c0_2 = arith.constant 0 : index
    %2 = vector.load %arg2[%c0_1, %c0_2] : memref<32x256xbf16, #tpu.memory_space<vmem>>, vector<32x256xbf16>
    %cst = arith.constant dense<0.000000e+00> : vector<8x256xf32>
    %3 = tpu.matmul %1, %2, %cst {dimension_numbers = #tpu.dot_dimension_numbers<[1], [0], [0], [1], [0, 0, 1, 1], [], []>} : vector<8x32xbf16>, vector<32x256xbf16>, vector<8x256xf32> -> vector<8x256xf32>
    %c0_3 = arith.constant 0 : index
    %c0_4 = arith.constant 0 : index
    %4 = vector.load %arg3[%c0_3, %c0_4] : memref<1x256xf32, #tpu.memory_space<vmem>>, vector<1x256xf32>
    %5 = vector.broadcast %4 : vector<1x256xf32> to vector<8x256xf32>
    %6 = arith.addf %3, %5 : vector<8x256xf32>
    %cst_5 = arith.constant 0.000000e+00 : f32
    %7 = vector.broadcast %cst_5 : f32 to vector<8x256xf32>
    %8 = arith.maximumf %6, %7 : vector<8x256xf32>
    %9 = arith.truncf %8 : vector<8x256xf32> to vector<8x256xbf16>
    %c0_6 = arith.constant 0 : index
    %c0_7 = arith.constant 0 : index
    %10 = vector.load %arg4[%c0_6, %c0_7] : memref<256x128xbf16, #tpu.memory_space<vmem>>, vector<256x128xbf16>
    %cst_8 = arith.constant dense<0.000000e+00> : vector<8x128xf32>
    %11 = tpu.matmul %9, %10, %cst_8 {dimension_numbers = #tpu.dot_dimension_numbers<[1], [0], [0], [1], [0, 0, 1, 1], [], []>} : vector<8x256xbf16>, vector<256x128xbf16>, vector<8x128xf32> -> vector<8x128xf32>
    %c0_9 = arith.constant 0 : index
    %c0_10 = arith.constant 0 : index
    %12 = vector.load %arg5[%c0_9, %c0_10] : memref<1x128xf32, #tpu.memory_space<vmem>>, vector<1x128xf32>
    %13 = vector.broadcast %12 : vector<1x128xf32> to vector<8x128xf32>
    %14 = arith.addf %11, %13 : vector<8x128xf32>
    %cst_11 = arith.constant 0.000000e+00 : f32
    %15 = vector.broadcast %cst_11 : f32 to vector<8x128xf32>
    %16 = arith.maximumf %14, %15 : vector<8x128xf32>
    %17 = arith.truncf %16 : vector<8x128xf32> to vector<8x128xbf16>
    %c0_12 = arith.constant 0 : index
    %c0_13 = arith.constant 0 : index
    %18 = vector.load %arg6[%c0_12, %c0_13] : memref<128x64xbf16, #tpu.memory_space<vmem>>, vector<128x64xbf16>
    %cst_14 = arith.constant dense<0.000000e+00> : vector<8x64xf32>
    %19 = tpu.matmul %17, %18, %cst_14 {dimension_numbers = #tpu.dot_dimension_numbers<[1], [0], [0], [1], [0, 0, 1, 1], [], []>} : vector<8x128xbf16>, vector<128x64xbf16>, vector<8x64xf32> -> vector<8x64xf32>
    %c0_15 = arith.constant 0 : index
    %c0_16 = arith.constant 0 : index
    %20 = vector.load %arg7[%c0_15, %c0_16] : memref<1x64xf32, #tpu.memory_space<vmem>>, vector<1x64xf32>
    %21 = vector.broadcast %20 : vector<1x64xf32> to vector<8x64xf32>
    %22 = arith.addf %19, %21 : vector<8x64xf32>
    %cst_17 = arith.constant 0.000000e+00 : f32
    %23 = vector.broadcast %cst_17 : f32 to vector<8x64xf32>
    %24 = arith.maximumf %22, %23 : vector<8x64xf32>
    %c0_18 = arith.constant 0 : index
    %c0_19 = arith.constant 0 : index
    %25 = vector.load %arg8[%c0_18, %c0_19] : memref<1x64xf32, #tpu.memory_space<vmem>>, vector<1x64xf32>
    %26 = vector.broadcast %25 : vector<1x64xf32> to vector<8x64xf32>
    %27 = arith.mulf %24, %26 : vector<8x64xf32>
    %cst_20 = arith.constant dense<0.000000e+00> : vector<8xf32>
    %28 = vector.multi_reduction <add>, %27, %cst_20 [1] : vector<8x64xf32> to vector<8xf32>
    %29 = vector.shape_cast %28 : vector<8xf32> to vector<8x1xf32>
    %c0_21 = arith.constant 0 : index
    %c0_22 = arith.constant 0 : index
    %30 = vector.load %arg9[%c0_21, %c0_22] : memref<1x1xf32, #tpu.memory_space<vmem>>, vector<1x1xf32>
    %31 = vector.broadcast %30 : vector<1x1xf32> to vector<8x1xf32>
    %32 = arith.addf %29, %31 : vector<8x1xf32>
    %c0_23 = arith.constant 0 : index
    %c0_24 = arith.constant 0 : index
    %33 = vector.load %arg10[%c0_23, %c0_24] : memref<8x1xf32, #tpu.memory_space<vmem>>, vector<8x1xf32>
    tpu.vector_store %arg10[%c0_23, %c0_24], %32 {strides = array<i32>} : memref<8x1xf32, #tpu.memory_space<vmem>>, vector<8x1xf32>,
    return
  }
  func.func @transform_0(%arg0: i32) -> (i32, i32) {
    %c0_i32 = arith.constant 0 : i32
    %c0_i32_0 = arith.constant 0 : i32
    return %arg0, %c0_i32 : i32, i32
  }
  func.func @transform_1(%arg0: i32) -> (i32, i32) {
    %c0_i32 = arith.constant 0 : i32
    %c0_i32_0 = arith.constant 0 : i32
    %c0_i32_1 = arith.constant 0 : i32
    return %c0_i32, %c0_i32_0 : i32, i32
  }
  func.func @transform_2(%arg0: i32) -> (i32, i32) {
    %c0_i32 = arith.constant 0 : i32
    %c0_i32_0 = arith.constant 0 : i32
    %c0_i32_1 = arith.constant 0 : i32
    return %c0_i32, %c0_i32_0 : i32, i32
  }
  func.func @transform_3(%arg0: i32) -> (i32, i32) {
    %c0_i32 = arith.constant 0 : i32
    %c0_i32_0 = arith.constant 0 : i32
    %c0_i32_1 = arith.constant 0 : i32
    return %c0_i32, %c0_i32_0 : i32, i32
  }
  func.func @transform_4(%arg0: i32) -> (i32, i32) {
    %c0_i32 = arith.constant 0 : i32
    %c0_i32_0 = arith.constant 0 : i32
    %c0_i32_1 = arith.constant 0 : i32
    return %c0_i32, %c0_i32_0 : i32, i32
  }
  func.func @transform_5(%arg0: i32) -> (i32, i32) {
    %c0_i32 = arith.constant 0 : i32
    %c0_i32_0 = arith.constant 0 : i32
    %c0_i32_1 = arith.constant 0 : i32
    return %c0_i32, %c0_i32_0 : i32, i32
  }
  func.func @transform_6(%arg0: i32) -> (i32, i32) {
    %c0_i32 = arith.constant 0 : i32
    %c0_i32_0 = arith.constant 0 : i32
    %c0_i32_1 = arith.constant 0 : i32
    return %c0_i32, %c0_i32_0 : i32, i32
  }
  func.func @transform_7(%arg0: i32) -> (i32, i32) {
    %c0_i32 = arith.constant 0 : i32
    %c0_i32_0 = arith.constant 0 : i32
    %c0_i32_1 = arith.constant 0 : i32
    return %c0_i32, %c0_i32_0 : i32, i32
  }
  func.func @transform_8(%arg0: i32) -> (i32, i32) {
    %c0_i32 = arith.constant 0 : i32
    %c0_i32_0 = arith.constant 0 : i32
    %c0_i32_1 = arith.constant 0 : i32
    return %c0_i32, %c0_i32_0 : i32, i32
  }
  func.func @transform_9(%arg0: i32) -> (i32, i32) {
    %c0_i32 = arith.constant 0 : i32
    %c0_i32_0 = arith.constant 0 : i32
    return %arg0, %c0_i32 : i32, i32
  }
}

</mosaic_0001>

<bundles_post_ra>
// kernel: tpu_custom_call.1
= control target key start
LH: loop header
LB: loop body
LE: loop exit
PB: predicated region body
PF: predicated region fallthrough
CT: control target
= control target key end

     0   :  { %s680_s0 = inlined_call_operand.vmem [shape: f32[8,32], index: 0, kind: input, shape index: {}]   ;;  %s681_s1 = inlined_call_operand.vmem [shape: bf16[32,256], index: 1, kind: input, shape index: {}]   ;;  %s682_s2 = inlined_call_operand.vmem [shape: f32[1,256], index: 2, kind: input, shape index: {}]   ;;  %s683_s3 = inlined_call_operand.hbm [shape: bf16[256,128], index: 3, kind: input, shape index: {}]   ;;  %s684_s4 = inlined_call_operand.vmem [shape: f32[1,128], index: 4, kind: input, shape index: {}]   ;;  %s685_s5 = inlined_call_operand.vmem [shape: bf16[128,64], index: 5, kind: input, shape index: {}]   ;;  %s686_s6 = inlined_call_operand.vmem [shape: f32[1,64], index: 6, kind: input, shape index: {}]   ;;  %s687_s7 = inlined_call_operand.vmem [shape: f32[1,64], index: 7, kind: input, shape index: {}]   ;;  %s688_s8 = inlined_call_operand.<no memory space> [shape: f32[1,1], index: 8, kind: input, shape index: {}]   ;;  %s689_s9 = inlined_call_operand.vmem [shape: f32[8,1], index: 9, kind: output, shape index: {}]  }
   0x1   :  { %v14_v0 = vstv %s688_s8 }
   0x2   :  { %15 = vst [vmem:[#allocation2] sm:$0x1] %v14_v0 }
   0x3   :  { %16 = vsyncpa [#allocation4], 0  ;;  %s27_s13 = sshll.u32 %s683_s3, 4  ;;  %s555_s14 = smov [#allocation3]   ;;  %s28_s13 = int_to_ptr.hbm [resolvable:$true] %s27_s13 }
   0x4   :  { %s29_s15 = sshll.u32 %s555_s14, 4  ;;  %s556_s16 = smov 64   ;;  %s30_s15 = int_to_ptr.vmem [resolvable:$true] %s29_s15 }
   0x5   :  { %s557_s17 = smov 4  }
   0x6   :  { %35 = dma.hbm_to_vmem [thread:$0]  %s28_s13, 2048, %s30_s15, [#allocation4], %s556_s16, %s556_s16, %s557_s17  }
   0x7   :  { %553 = dma.done.wait [#allocation4], 2048  }
   0x8   :  { %554 = vsyncadd [#allocation4], 4294965248  ;;  %v390_v1 = vld [vmem:[%s681_s1 + $0x10] sm:$0xf]  ;;  %v497_v2 = vld [vmem:[%s681_s1 + $0x14] sm:$0xf0] }
   0x9   :  { %v382_v3 = vld [vmem:[%s681_s1] sm:$0xf]  ;;  %v391_v4 = vor.u32 %v497_v2, %v390_v1  ;;  %v495_v5 = vld [vmem:[%s681_s1 + $0x4] sm:$0xf0]  ;;  %v496_v6 = vld [vmem:[%s681_s1 + $0x14] sm:$0xf] }
   0xa   :  { %v392_v7 = vld [vmem:[%s681_s1 + $0x18] sm:$0xf0]  ;;  %v383_v8 = vor.u32 %v495_v5, %v382_v3  ;;  %v51_v9 = vld [vmem:[%s680_s0] sm:$0xff]  ;;  %v384_v14 = vld [vmem:[%s681_s1 + $0x8] sm:$0xf0]  ;;  %vm83_vm0 = vcmask 261120  }
   0xb   :  { %93 = vmatpush.bf16.msra.mxu1 %v391_v4  ;;  %v505_v10 = vld [vmem:[#allocation3 + $0x38] sm:$0xff]  ;;  %v395_v11 = vor.u32 %v496_v6, %v392_v7  ;;  %v494_v13 = vld [vmem:[%s681_s1 + $0x4] sm:$0xf]  ;;  %v504_v15 = vld [vmem:[#allocation3 + $0x30] sm:$0xff]  ;;  %v52_v16 = vpack.c.bf16 %v51_v9, %v51_v9  ;;  %vm364_vm1 = vcmask 523264   ;;  %vm373_vm2 = vcmask 7168  }
   0xc   :  { %v513_v12 = vld [vmem:[#allocation3 + $0x78] sm:$0xff]  ;;  %249 = vmatpush.bf16.msra.mxu2 %v505_v10  ;;  %v512_v17 = vld [vmem:[#allocation3 + $0x70] sm:$0xff]  ;;  %v387_v18 = vor.u32 %v494_v13, %v384_v14  ;;  %v503_v19 = vld [vmem:[#allocation3 + $0x28] sm:$0xff] }
   0xd   :  { %262 = vmatpush.bf16.msra.mxu3 %v513_v12  ;;  %v502_v20 = vld [vmem:[#allocation3 + $0x20] sm:$0xff]  ;;  %v501_v21 = vld [vmem:[#allocation3 + $0x18] sm:$0xff]  ;;  %v500_v22 = vld [vmem:[#allocation3 + $0x10] sm:$0xff] }
   0xe   :  { %v499_v23 = vld [vmem:[#allocation3 + $0x8] sm:$0xff]  ;;  %v498_v25 = vld [vmem:[#allocation3] sm:$0xff]  ;;  %v509_v27 = vld [vmem:[#allocation3 + $0x58] sm:$0xff] }
   0xf   :  { %94 = vmatpush.bf16.msra.mxu1 %v383_v8  ;;  %v511_v24 = vld [vmem:[#allocation3 + $0x68] sm:$0xff]  ;;  %v510_v26 = vld [vmem:[#allocation3 + $0x60] sm:$0xff]  ;;  %v508_v28 = vld [vmem:[#allocation3 + $0x50] sm:$0xff] }
  0x10   :  { %250 = vmatpush.bf16.msra.mxu2 %v504_v15  ;;  %v507_v29 = vld [vmem:[#allocation3 + $0x48] sm:$0xff]  ;;  %v506_v30 = vld [vmem:[#allocation3 + $0x40] sm:$0xff]  ;;  %v521_v31 = vld [vmem:[%s685_s5 + $0x38] sm:$0xff] }
  0x11   :  { %263 = vmatpush.bf16.msra.mxu3 %v512_v17  ;;  %v57_v32 = vld [vmem:[%s682_s2] sm:$0x3]  ;;  %345 = vmatpush.bf16.msra.mxu0 %v521_v31  ;;  %v520_v33 = vld [vmem:[%s685_s5 + $0x30] sm:$0xff]  ;;  %v519_v46 = vld [vmem:[%s685_s5 + $0x28] sm:$0xff] }
  0x12   :  { %396 = vmatmul.msk.bf16.vlgmr.msra.gmra.mxu1 %vm83_vm0, %v52_v16  ;;  %v59_v34 = vperm.slane %v57_v32, 0  ;;  %v60_v40 = vperm.slane %v57_v32, 1  ;;  %v518_v47 = vld [vmem:[%s685_s5 + $0x20] sm:$0xff]  ;;  %v517_v48 = vld [vmem:[%s685_s5 + $0x18] sm:$0xff]  ;;  %v516_v49 = vld [vmem:[%s685_s5 + $0x10] sm:$0xff] }
  0x13   :  { %106 = vmatpush.bf16.msrb.mxu1 %v395_v11  ;;  %v515_v50 = vld [vmem:[%s685_s5 + $0x8] sm:$0xff]  ;;  %v514_v51 = vld [vmem:[%s685_s5] sm:$0xff] }
  0x14   :  { %251 = vmatpush.bf16.msra.mxu2 %v503_v19  ;;  %v525_v54 = vld [vmem:[%s684_s4] ss:$0 sm:$0xff] }
  0x15   :  { %264 = vmatpush.bf16.msra.mxu3 %v511_v24  ;;  %346 = vmatpush.bf16.msra.mxu0 %v520_v33  ;;  %v526_v61 = vld [vmem:[%s686_s6] ss:$0 sm:$0xff] }
  0x16   :  { %v527_v0 = vld [vmem:[%s687_s7] ss:$0 sm:$0xff] }
  0x17   :  { %107 = vmatpush.bf16.msrb.mxu1 %v387_v18  ;;  %v528_v5 = vld [vmem:[#allocation2] ss:$0 sm:$0xff] }
  0x18   :  { %252 = vmatpush.bf16.msra.mxu2 %v502_v20 }
  0x19   :  { %265 = vmatpush.bf16.msra.mxu3 %v510_v26  ;;  %347 = vmatpush.bf16.msra.mxu0 %v519_v46 }
  0x1c   :  { %253 = vmatpush.bf16.msra.mxu2 %v501_v21 }
  0x1d   :  { %266 = vmatpush.bf16.msra.mxu3 %v509_v27  ;;  %348 = vmatpush.bf16.msra.mxu0 %v518_v47 }
  0x20   :  { %254 = vmatpush.bf16.msra.mxu2 %v500_v22 }
  0x21   :  { %267 = vmatpush.bf16.msra.mxu3 %v508_v28  ;;  %349 = vmatpush.bf16.msra.mxu0 %v517_v48 }
  0x22   :  { %397 = vmatmul.msk.bf16.vlgmr.msrb.gmra.mxu1 %vm83_vm0, %v52_v16 }
  0x24   :  { %255 = vmatpush.bf16.msra.mxu2 %v499_v23 }
  0x25   :  { %268 = vmatpush.bf16.msra.mxu3 %v507_v29  ;;  %350 = vmatpush.bf16.msra.mxu0 %v516_v49 }
  0x28   :  { %256 = vmatpush.bf16.msra.mxu2 %v498_v25 }
  0x29   :  { %269 = vmatpush.bf16.msra.mxu3 %v506_v30  ;;  %351 = vmatpush.bf16.msra.mxu0 %v515_v50 }
  0x2d   :  { %352 = vmatpush.bf16.msra.mxu0 %v514_v51 }
  0x8f   :  { %v96_v35 = vpop.f32.mrf.mxu1 }
  0x90   :  { %v97_v36 = vadd.f32 %v96_v35, %v59_v34 }
  0x92   :  { %v113_v37 = vmax.f32 %v97_v36, 0.0 }
  0x94   :  { %v115_v38 = vpack.c.bf16 %v113_v37, %v113_v37 }
  0x96   :  { %257 = vmatmul.bf16.vlgmr.msra.gmra.mxu2 %v115_v38 }
  0x97   :  { %v98_v39 = vpop.f32.mrf.mxu1 }
  0x9f   :  { %v109_v41 = vpop.f32.mrf.mxu1 }
  0xa0   :  { %v110_v42 = vadd.f32 %v109_v41, %v60_v40 }
  0xa2   :  { %v114_v43 = vmax.f32 %v110_v42, 0.0 }
  0xa4   :  { %v116_v44 = vpack.c.bf16 %v114_v43, %v114_v43 }
  0xa6   :  { %270 = vmatmul.bf16.vlgmr.msra.gmra.mxu3 %v116_v44 }
  0xa7   :  { %v111_v45 = vpop.f32.mrf.mxu1 }
 0x119   :  { %v258_v52 = vpop.f32.mrf.mxu2 }
 0x11a   :  { %v259_v55 = vadd.f32 %v525_v54, %v258_v52 }
 0x121   :  { %v260_v53 = vpop.f32.mrf.mxu2 }
 0x129   :  { %v271_v56 = vpop.f32.mrf.mxu3 }
 0x12a   :  { %v272_v57 = vadd.f32 %v271_v56, %v259_v55 }
 0x12c   :  { %v275_v58 = vmax.f32 %v272_v57, 0.0 }
 0x12e   :  { %v276_v59 = vpack.c.bf16 %v275_v58, %v275_v58 }
 0x130   :  { %353 = vmatmul.bf16.vlgmr.msra.gmra.mxu0 %v276_v59 }
 0x131   :  { %v273_v60 = vpop.f32.mrf.mxu3 }
 0x1ad   :  { %v354_v62 = vpop.f32.mrf.mxu0 }
 0x1ae   :  { %v355_v63 = vadd.f32 %v526_v61, %v354_v62 }
 0x1b0   :  { %v358_v1 = vmax.f32 %v355_v63, 0.0 }
 0x1b2   :  { %v363_v2 = vmul.f32 %v527_v0, %v358_v1 }
 0x1b4   :  { %v365_v3 = vsel %vm364_vm1, %v363_v2, 0.0 }
 0x1b5   :  { %v356_v4 = vpop.f32.mrf.mxu0  ;;  %366 = vadd.xlane.f32.xlu0 %v365_v3 }
 0x228   :  { %v367_v6 = vpop.xlane.xlu0 %366 }
 0x229   :  { %v372_v7 = vadd.f32 %v528_v5, %v367_v6 }
 0x22b   :  { %374 = vst.msk [vmem:[%s689_s9] sm:$0xff] %vm373_vm2, %v372_v7 }
 0x22c   :  { %379 = vsyncpa [#allocation4], 1 }

</bundles_post_ra>
